<compile_context>
chip_gen: v5e
topology: v5e:2x2
jax: 0.10.0
libtpu: 0.0.40
codegen_flags: <defaults>
</compile_context>

<pallas_src>
import functools

import jax
import jax.numpy as jnp
from jax.experimental import pallas as pl
from jax.experimental.pallas import tpu as pltpu


def _round_up(x, m):
    return ((x + m - 1) // m) * m


def _mlp_kernel(x_ref, we_ref, be_ref, wm_ref, bm_ref, g_ref, bb_ref,
                wp_ref, bp_ref, out_ref, *, eps):
    """Forward pass for one lane-dense batch tile (batch on lanes).

    Shapes (all feature-major / batch-on-lanes):
      x_ref  : (dim, TN)        we_ref : (H, dim)      be_ref : (H, 1)
      wm_ref : (L, H, H)        bm_ref : (L, H, 1)
      g_ref  : (L, H, 1)        bb_ref : (L, H, 1)
      wp_ref : (dim, H)         bp_ref : (dim, 1)      out_ref: (dim, TN)
    """
    x = x_ref[...].astype(jnp.float32)            # (dim, TN)
    dim = x_ref.shape[0]
    hidden = we_ref.shape[0]
    n_layers = wm_ref.shape[0]
    w_dtype = wm_ref.dtype

    # --- Embedding: h_t = W_emb @ x_t + b --------------------------------
    if dim <= 8:
        # Degenerate contraction depth (dim=2): broadcast FMAs on the VPU.
        # x rows broadcast along sublanes (cheap stride-0), weight columns
        # broadcast along lanes; avoids an MXU push/pop with K=2.
        we = we_ref[...].astype(jnp.float32)       # (H, dim)
        h = we[:, 0:1] * x[0:1, :]
        for k in range(1, dim):
            h = h + we[:, k:k + 1] * x[k:k + 1, :]
        h = h + be_ref[...]
    else:
        h = jnp.dot(we_ref[...].astype(jnp.float32), x,
                    preferred_element_type=jnp.float32) + be_ref[...]

    inv_h = 1.0 / float(hidden)

    # --- Hidden layers: Linear -> LayerNorm -> Tanh -----------------------
    def layer_body(l, h):
        y = jnp.dot(wm_ref[l], h.astype(w_dtype),
                    preferred_element_type=jnp.float32) + bm_ref[l]
        # One-pass LayerNorm statistics over the feature (sublane) axis; the
        # two reductions are independent and overlap on the XLUs.  Stats in
        # f32 regardless of the matmul operand dtype.
        s1 = jnp.sum(y, axis=0, keepdims=True)
        s2 = jnp.sum(y * y, axis=0, keepdims=True)
        mean = s1 * inv_h
        var = jnp.maximum(s2 * inv_h - mean * mean, 0.0)   # clamp cancellation
        y = (y - mean) * jax.lax.rsqrt(var + eps)
        y = y * g_ref[l] + bb_ref[l]
        return jnp.tanh(y)

    # Fully unrolled: n_layers is small & static, so the scheduler sees the
    # whole chain and wm_ref[l] indexing becomes static per-layer.
    h = jax.lax.fori_loop(0, n_layers, layer_body, h, unroll=True)

    # --- Projection: out_t = W_proj @ h_t + b  (W_proj = W_emb.T, tied) ----
    out = jnp.dot(wp_ref[...].astype(jnp.float32), h,
                  preferred_element_type=jnp.float32) + bp_ref[...]
    out_ref[...] = out.astype(out_ref.dtype)


def neural_network_forward(x, params, *, eps=1e-5, tile_n=512,
                           compute_dtype=jnp.float32):
    """Distortion-MLP forward pass as a batch-tiled, lane-dense Pallas call.

    x: (N, dim).  Returns (N, dim).  `compute_dtype` controls the middle-stack
    matmul operand dtype (bf16 halves weight footprint / doubles MXU rate);
    accumulation and LayerNorm statistics stay f32.
    """
    w_emb, b_emb, w_mid, b_mid, g, bb, w_proj, b_proj = params
    n, dim = x.shape
    hidden = w_emb.shape[0]
    n_layers = w_mid.shape[0]

    # Batch tile on the LANE axis: multiple of 128, and the batch is padded to
    # an exact multiple of the tile so all blocks are full (8,128)-legal.
    # Single grid step at toy sizes; multiple independent ("parallel") tiles
    # at larger N (v7x megacore shards them across its two TensorCores).
    tn = max(128, (min(int(tile_n), _round_up(n, 128)) // 128) * 128)
    n_pad = _round_up(n, tn)
    grid = (n_pad // tn,)

    # Lane-dense input slab: (dim, N_pad) with batch on lanes, zero padded.
    x_t = jnp.pad(x.T, ((0, 0), (0, n_pad - n)))

    # Kernel-friendly parameter layouts (feature-major column vectors).
    be_ = b_emb.reshape(hidden, 1)
    bm_ = b_mid.reshape(n_layers, hidden, 1)
    g_ = g.reshape(n_layers, hidden, 1)
    bb_ = bb.reshape(n_layers, hidden, 1)
    bp_ = b_proj.reshape(dim, 1)
    wm_ = w_mid.astype(compute_dtype)              # bf16 option for the MXU

    kernel = functools.partial(_mlp_kernel, eps=eps)

    # Whole-array VMEM residents: single-buffered, DMA'd once, no per-step
    # pipeline bookkeeping (important under v5e's 16 MiB default scoped VMEM).
    resident = pl.BlockSpec(memory_space=pltpu.MemorySpace.VMEM)

    out_t = pl.pallas_call(
        kernel,
        out_shape=jax.ShapeDtypeStruct((dim, n_pad), x.dtype),
        grid_spec=pltpu.PrefetchScalarGridSpec(
            num_scalar_prefetch=0,
            grid=grid,
            in_specs=[
                pl.BlockSpec((dim, tn), lambda i: (0, i)),  # x tile (lane-dense)
                resident,                                   # embedding W (H, dim)
                resident,                                   # embedding bias (H, 1)
                resident,                                   # middle W (L, H, H)
                resident,                                   # middle biases (L, H, 1)
                resident,                                   # layernorm gamma (L, H, 1)
                resident,                                   # layernorm beta (L, H, 1)
                resident,                                   # projection W (dim, H)
                resident,                                   # projection bias (dim, 1)
            ],
            out_specs=pl.BlockSpec((dim, tn), lambda i: (0, i)),
        ),
        compiler_params=pltpu.CompilerParams(
            # Batch tiles are independent -> parallel (v7x megacore can shard).
            dimension_semantics=("parallel",)),
    )(x_t, w_emb, be_, wm_, bm_, g_, bb_, w_proj, bp_)

    # Strip batch padding and return in the module's (N, dim) layout.
    return out_t[:, :n].T


def init_params(key, hidden_dim, dim, n_layers):
    """Deterministic PyTorch-style (uniform +/- 1/sqrt(fan_in)) init.

    All weights are kept in PyTorch's native (out_features, in_features)
    layout, which is exactly what the transposed kernel consumes.
    """
    keys = jax.random.split(key, 4 + 2 * n_layers)

    bound_e = 1.0 / (dim ** 0.5)
    w_emb = jax.random.uniform(keys[0], (hidden_dim, dim), jnp.float32,
                               -bound_e, bound_e)
    b_emb = jax.random.uniform(keys[1], (hidden_dim,), jnp.float32,
                               -bound_e, bound_e)

    bound_h = 1.0 / (hidden_dim ** 0.5)
    w_mid = jnp.stack([
        jax.random.uniform(keys[2 + 2 * i], (hidden_dim, hidden_dim),
                           jnp.float32, -bound_h, bound_h)
        for i in range(n_layers)])                       # (L, H, H)
    b_mid = jnp.stack([
        jax.random.uniform(keys[3 + 2 * i], (hidden_dim,),
                           jnp.float32, -bound_h, bound_h)
        for i in range(n_layers)])                       # (L, H)

    g = jnp.ones((n_layers, hidden_dim), jnp.float32)    # LayerNorm gamma
    bb = jnp.zeros((n_layers, hidden_dim), jnp.float32)  # LayerNorm beta

    # Tied projection: projection.weight = embedding.weight.T -> (dim, H).
    w_proj = w_emb.T
    b_proj = jax.random.uniform(keys[2 + 2 * n_layers], (dim,), jnp.float32,
                                -bound_h, bound_h)

    return (w_emb, b_emb, w_mid, b_mid, g, bb, w_proj, b_proj)


def reference_forward(x, params, eps=1e-5):
    """Pure-JAX reference matching the PyTorch module semantics."""
    w_emb, b_emb, w_mid, b_mid, g, bb, w_proj, b_proj = params
    h = x @ w_emb.T + b_emb
    for l in range(w_mid.shape[0]):
        y = h @ w_mid[l].T + b_mid[l]
        mean = jnp.mean(y, axis=-1, keepdims=True)
        var = jnp.mean(jnp.square(y - mean), axis=-1, keepdims=True)
        y = (y - mean) / jnp.sqrt(var + eps)
        h = jnp.tanh(y * g[l] + bb[l])
    return h @ w_proj.T + b_proj


if __name__ == "__main__":
    # Small shapes consistent with the module's forward: x is (n_samples, dim).
    hidden_dim, dim, n_layers, batch = 32, 2, 4, 48

    key = jax.random.PRNGKey(0)
    k_params, k_x = jax.random.split(key)
    params = init_params(k_params, hidden_dim, dim, n_layers)
    x = jax.random.normal(k_x, (batch, dim), jnp.float32)
    ref = reference_forward(x, params)

    # 1) f32 path, single lane-dense tile (grid = (1,)).
    out = jax.block_until_ready(neural_network_forward(x, params))
    assert out.shape == (batch, dim)
    assert jnp.allclose(out, ref, atol=1e-4, rtol=1e-4), "f32 mismatch vs reference"

    # 2) Multi-tile path: batch padded to 384, grid = (3,), parallel tiles.
    x2 = jax.random.normal(jax.random.PRNGKey(1), (300, dim), jnp.float32)
    ref2 = reference_forward(x2, params)
    out2 = jax.block_until_ready(neural_network_forward(x2, params, tile_n=128))
    assert out2.shape == (300, dim)
    assert jnp.allclose(out2, ref2, atol=1e-4, rtol=1e-4), "tiled mismatch vs reference"

    # 3) bf16 middle-stack matmul operands (f32 accumulation / LN stats);
    #    tolerance reflects bf16 operand rounding only.
    out_bf = jax.block_until_ready(
        neural_network_forward(x, params, compute_dtype=jnp.bfloat16))
    assert jnp.allclose(out_bf, ref, atol=1e-1, rtol=1e-1), "bf16 mismatch vs reference"

    print("KERNEL_OK")
</pallas_src>

<mosaic_0001>
module attributes {stable_mosaic.version = 11 : i64} {
  func.func @_mlp_kernel(%arg0: i32, %arg1: memref<2x128xf32, #tpu.memory_space<vmem>>, %arg2: memref<32x2xf32, #tpu.memory_space<vmem>>, %arg3: memref<32x1xf32, #tpu.memory_space<vmem>>, %arg4: memref<4x32x32xf32, #tpu.memory_space<vmem>>, %arg5: memref<4x32x1xf32, #tpu.memory_space<vmem>>, %arg6: memref<4x32x1xf32, #tpu.memory_space<vmem>>, %arg7: memref<4x32x1xf32, #tpu.memory_space<vmem>>, %arg8: memref<2x32xf32, #tpu.memory_space<vmem>>, %arg9: memref<2x1xf32, #tpu.memory_space<vmem>>, %arg10: memref<2x128xf32, #tpu.memory_space<vmem>>) attributes {dimension_semantics = [#tpu.dimension_semantics<parallel>], iteration_bounds = array<i64: 1>, scalar_prefetch = 0 : i64, scratch_operands = 0 : i64, tpu.core_type = #tpu.core_type<tc>, window_params = [{transform_indices = @transform_0, window_bounds = array<i64: 2, 128>}, {pipeline_mode = #tpu.pipeline_mode<synchronous>, transform_indices = @transform_1, window_bounds = array<i64: 32, 2>}, {pipeline_mode = #tpu.pipeline_mode<synchronous>, transform_indices = @transform_2, window_bounds = array<i64: 32, 1>}, {pipeline_mode = #tpu.pipeline_mode<synchronous>, transform_indices = @transform_3, window_bounds = array<i64: 4, 32, 32>}, {pipeline_mode = #tpu.pipeline_mode<synchronous>, transform_indices = @transform_4, window_bounds = array<i64: 4, 32, 1>}, {pipeline_mode = #tpu.pipeline_mode<synchronous>, transform_indices = @transform_5, window_bounds = array<i64: 4, 32, 1>}, {pipeline_mode = #tpu.pipeline_mode<synchronous>, transform_indices = @transform_6, window_bounds = array<i64: 4, 32, 1>}, {pipeline_mode = #tpu.pipeline_mode<synchronous>, transform_indices = @transform_7, window_bounds = array<i64: 2, 32>}, {pipeline_mode = #tpu.pipeline_mode<synchronous>, transform_indices = @transform_8, window_bounds = array<i64: 2, 1>}, {transform_indices = @transform_9, window_bounds = array<i64: 2, 128>}]} {
    %c0 = arith.constant 0 : index
    %c0_0 = arith.constant 0 : index
    %0 = vector.load %arg1[%c0, %c0_0] : memref<2x128xf32, #tpu.memory_space<vmem>>, vector<2x128xf32>
    %c0_1 = arith.constant 0 : index
    %c0_2 = arith.constant 0 : index
    %1 = vector.load %arg2[%c0_1, %c0_2] : memref<32x2xf32, #tpu.memory_space<vmem>>, vector<32x2xf32>
    %2 = vector.extract_strided_slice %1 {offsets = [0, 0], sizes = [32, 1], strides = [1, 1]} : vector<32x2xf32> to vector<32x1xf32>
    %3 = vector.extract_strided_slice %0 {offsets = [0, 0], sizes = [1, 128], strides = [1, 1]} : vector<2x128xf32> to vector<1x128xf32>
    %4 = vector.broadcast %2 : vector<32x1xf32> to vector<32x128xf32>
    %5 = vector.broadcast %3 : vector<1x128xf32> to vector<32x128xf32>
    %6 = arith.mulf %4, %5 : vector<32x128xf32>
    %7 = vector.extract_strided_slice %1 {offsets = [0, 1], sizes = [32, 1], strides = [1, 1]} : vector<32x2xf32> to vector<32x1xf32>
    %8 = vector.extract_strided_slice %0 {offsets = [1, 0], sizes = [1, 128], strides = [1, 1]} : vector<2x128xf32> to vector<1x128xf32>
    %9 = vector.broadcast %7 : vector<32x1xf32> to vector<32x128xf32>
    %10 = vector.broadcast %8 : vector<1x128xf32> to vector<32x128xf32>
    %11 = arith.mulf %9, %10 : vector<32x128xf32>
    %12 = arith.addf %6, %11 : vector<32x128xf32>
    %c0_3 = arith.constant 0 : index
    %c0_4 = arith.constant 0 : index
    %13 = vector.load %arg3[%c0_3, %c0_4] : memref<32x1xf32, #tpu.memory_space<vmem>>, vector<32x1xf32>
    %14 = vector.broadcast %13 : vector<32x1xf32> to vector<32x128xf32>
    %15 = arith.addf %12, %14 : vector<32x128xf32>
    %c0_i32 = arith.constant 0 : i32
    %16 = arith.index_cast %c0_i32 : i32 to index
    %c0_5 = arith.constant 0 : index
    %c0_6 = arith.constant 0 : index
    %17 = vector.load %arg4[%16, %c0_5, %c0_6] : memref<4x32x32xf32, #tpu.memory_space<vmem>>, vector<1x32x32xf32>
    %18 = vector.shape_cast %17 : vector<1x32x32xf32> to vector<32x32xf32>
    %cst = arith.constant dense<0.000000e+00> : vector<32x128xf32>
    %19 = tpu.matmul %18, %15, %cst {dimension_numbers = #tpu.dot_dimension_numbers<[1], [0], [0], [1], [0, 0, 1, 1], [], []>} : vector<32x32xf32>, vector<32x128xf32>, vector<32x128xf32> -> vector<32x128xf32>
    %20 = arith.index_cast %c0_i32 : i32 to index
    %c0_7 = arith.constant 0 : index
    %c0_8 = arith.constant 0 : index
    %21 = vector.load %arg5[%20, %c0_7, %c0_8] : memref<4x32x1xf32, #tpu.memory_space<vmem>>, vector<1x32x1xf32>
    %22 = vector.shape_cast %21 : vector<1x32x1xf32> to vector<32x1xf32>
    %23 = vector.broadcast %22 : vector<32x1xf32> to vector<32x128xf32>
    %24 = arith.addf %19, %23 : vector<32x128xf32>
    %cst_9 = arith.constant dense<0.000000e+00> : vector<128xf32>
    %25 = vector.multi_reduction <add>, %24, %cst_9 [0] : vector<32x128xf32> to vector<128xf32>
    %26 = vector.shape_cast %25 : vector<128xf32> to vector<1x128xf32>
    %27 = arith.mulf %24, %24 : vector<32x128xf32>
    %cst_10 = arith.constant dense<0.000000e+00> : vector<128xf32>
    %28 = vector.multi_reduction <add>, %27, %cst_10 [0] : vector<32x128xf32> to vector<128xf32>
    %29 = vector.shape_cast %28 : vector<128xf32> to vector<1x128xf32>
    %cst_11 = arith.constant 3.125000e-02 : f32
    %30 = vector.broadcast %cst_11 : f32 to vector<1x128xf32>
    %31 = arith.mulf %26, %30 : vector<1x128xf32>
    %cst_12 = arith.constant 3.125000e-02 : f32
    %32 = vector.broadcast %cst_12 : f32 to vector<1x128xf32>
    %33 = arith.mulf %29, %32 : vector<1x128xf32>
    %34 = arith.mulf %31, %31 : vector<1x128xf32>
    %35 = arith.subf %33, %34 : vector<1x128xf32>
    %cst_13 = arith.constant 0.000000e+00 : f32
    %36 = vector.broadcast %cst_13 : f32 to vector<1x128xf32>
    %37 = arith.maximumf %35, %36 : vector<1x128xf32>
    %38 = vector.broadcast %31 : vector<1x128xf32> to vector<32x128xf32>
    %39 = arith.subf %24, %38 : vector<32x128xf32>
    %cst_14 = arith.constant 9.99999974E-6 : f32
    %40 = vector.broadcast %cst_14 : f32 to vector<1x128xf32>
    %41 = arith.addf %37, %40 : vector<1x128xf32>
    %42 = math.rsqrt %41 : vector<1x128xf32>
    %43 = vector.broadcast %42 : vector<1x128xf32> to vector<32x128xf32>
    %44 = arith.mulf %39, %43 : vector<32x128xf32>
    %45 = arith.index_cast %c0_i32 : i32 to index
    %c0_15 = arith.constant 0 : index
    %c0_16 = arith.constant 0 : index
    %46 = vector.load %arg6[%45, %c0_15, %c0_16] : memref<4x32x1xf32, #tpu.memory_space<vmem>>, vector<1x32x1xf32>
    %47 = vector.shape_cast %46 : vector<1x32x1xf32> to vector<32x1xf32>
    %48 = vector.broadcast %47 : vector<32x1xf32> to vector<32x128xf32>
    %49 = arith.mulf %44, %48 : vector<32x128xf32>
    %50 = arith.index_cast %c0_i32 : i32 to index
    %c0_17 = arith.constant 0 : index
    %c0_18 = arith.constant 0 : index
    %51 = vector.load %arg7[%50, %c0_17, %c0_18] : memref<4x32x1xf32, #tpu.memory_space<vmem>>, vector<1x32x1xf32>
    %52 = vector.shape_cast %51 : vector<1x32x1xf32> to vector<32x1xf32>
    %53 = vector.broadcast %52 : vector<32x1xf32> to vector<32x128xf32>
    %54 = arith.addf %49, %53 : vector<32x128xf32>
    %55 = math.tanh %54 : vector<32x128xf32>
    %c1_i32 = arith.constant 1 : i32
    %56 = arith.index_cast %c1_i32 : i32 to index
    %c0_19 = arith.constant 0 : index
    %c0_20 = arith.constant 0 : index
    %57 = vector.load %arg4[%56, %c0_19, %c0_20] : memref<4x32x32xf32, #tpu.memory_space<vmem>>, vector<1x32x32xf32>
    %58 = vector.shape_cast %57 : vector<1x32x32xf32> to vector<32x32xf32>
    %cst_21 = arith.constant dense<0.000000e+00> : vector<32x128xf32>
    %59 = tpu.matmul %58, %55, %cst_21 {dimension_numbers = #tpu.dot_dimension_numbers<[1], [0], [0], [1], [0, 0, 1, 1], [], []>} : vector<32x32xf32>, vector<32x128xf32>, vector<32x128xf32> -> vector<32x128xf32>
    %60 = arith.index_cast %c1_i32 : i32 to index
    %c0_22 = arith.constant 0 : index
    %c0_23 = arith.constant 0 : index
    %61 = vector.load %arg5[%60, %c0_22, %c0_23] : memref<4x32x1xf32, #tpu.memory_space<vmem>>, vector<1x32x1xf32>
    %62 = vector.shape_cast %61 : vector<1x32x1xf32> to vector<32x1xf32>
    %63 = vector.broadcast %62 : vector<32x1xf32> to vector<32x128xf32>
    %64 = arith.addf %59, %63 : vector<32x128xf32>
    %cst_24 = arith.constant dense<0.000000e+00> : vector<128xf32>
    %65 = vector.multi_reduction <add>, %64, %cst_24 [0] : vector<32x128xf32> to vector<128xf32>
    %66 = vector.shape_cast %65 : vector<128xf32> to vector<1x128xf32>
    %67 = arith.mulf %64, %64 : vector<32x128xf32>
    %cst_25 = arith.constant dense<0.000000e+00> : vector<128xf32>
    %68 = vector.multi_reduction <add>, %67, %cst_25 [0] : vector<32x128xf32> to vector<128xf32>
    %69 = vector.shape_cast %68 : vector<128xf32> to vector<1x128xf32>
    %cst_26 = arith.constant 3.125000e-02 : f32
    %70 = vector.broadcast %cst_26 : f32 to vector<1x128xf32>
    %71 = arith.mulf %66, %70 : vector<1x128xf32>
    %cst_27 = arith.constant 3.125000e-02 : f32
    %72 = vector.broadcast %cst_27 : f32 to vector<1x128xf32>
    %73 = arith.mulf %69, %72 : vector<1x128xf32>
    %74 = arith.mulf %71, %71 : vector<1x128xf32>
    %75 = arith.subf %73, %74 : vector<1x128xf32>
    %cst_28 = arith.constant 0.000000e+00 : f32
    %76 = vector.broadcast %cst_28 : f32 to vector<1x128xf32>
    %77 = arith.maximumf %75, %76 : vector<1x128xf32>
    %78 = vector.broadcast %71 : vector<1x128xf32> to vector<32x128xf32>
    %79 = arith.subf %64, %78 : vector<32x128xf32>
    %cst_29 = arith.constant 9.99999974E-6 : f32
    %80 = vector.broadcast %cst_29 : f32 to vector<1x128xf32>
    %81 = arith.addf %77, %80 : vector<1x128xf32>
    %82 = math.rsqrt %81 : vector<1x128xf32>
    %83 = vector.broadcast %82 : vector<1x128xf32> to vector<32x128xf32>
    %84 = arith.mulf %79, %83 : vector<32x128xf32>
    %85 = arith.index_cast %c1_i32 : i32 to index
    %c0_30 = arith.constant 0 : index
    %c0_31 = arith.constant 0 : index
    %86 = vector.load %arg6[%85, %c0_30, %c0_31] : memref<4x32x1xf32, #tpu.memory_space<vmem>>, vector<1x32x1xf32>
    %87 = vector.shape_cast %86 : vector<1x32x1xf32> to vector<32x1xf32>
    %88 = vector.broadcast %87 : vector<32x1xf32> to vector<32x128xf32>
    %89 = arith.mulf %84, %88 : vector<32x128xf32>
    %90 = arith.index_cast %c1_i32 : i32 to index
    %c0_32 = arith.constant 0 : index
    %c0_33 = arith.constant 0 : index
    %91 = vector.load %arg7[%90, %c0_32, %c0_33] : memref<4x32x1xf32, #tpu.memory_space<vmem>>, vector<1x32x1xf32>
    %92 = vector.shape_cast %91 : vector<1x32x1xf32> to vector<32x1xf32>
    %93 = vector.broadcast %92 : vector<32x1xf32> to vector<32x128xf32>
    %94 = arith.addf %89, %93 : vector<32x128xf32>
    %95 = math.tanh %94 : vector<32x128xf32>
    %c2_i32 = arith.constant 2 : i32
    %96 = arith.index_cast %c2_i32 : i32 to index
    %c0_34 = arith.constant 0 : index
    %c0_35 = arith.constant 0 : index
    %97 = vector.load %arg4[%96, %c0_34, %c0_35] : memref<4x32x32xf32, #tpu.memory_space<vmem>>, vector<1x32x32xf32>
    %98 = vector.shape_cast %97 : vector<1x32x32xf32> to vector<32x32xf32>
    %cst_36 = arith.constant dense<0.000000e+00> : vector<32x128xf32>
    %99 = tpu.matmul %98, %95, %cst_36 {dimension_numbers = #tpu.dot_dimension_numbers<[1], [0], [0], [1], [0, 0, 1, 1], [], []>} : vector<32x32xf32>, vector<32x128xf32>, vector<32x128xf32> -> vector<32x128xf32>
    %100 = arith.index_cast %c2_i32 : i32 to index
    %c0_37 = arith.constant 0 : index
    %c0_38 = arith.constant 0 : index
    %101 = vector.load %arg5[%100, %c0_37, %c0_38] : memref<4x32x1xf32, #tpu.memory_space<vmem>>, vector<1x32x1xf32>
    %102 = vector.shape_cast %101 : vector<1x32x1xf32> to vector<32x1xf32>
    %103 = vector.broadcast %102 : vector<32x1xf32> to vector<32x128xf32>
    %104 = arith.addf %99, %103 : vector<32x128xf32>
    %cst_39 = arith.constant dense<0.000000e+00> : vector<128xf32>
    %105 = vector.multi_reduction <add>, %104, %cst_39 [0] : vector<32x128xf32> to vector<128xf32>
    %106 = vector.shape_cast %105 : vector<128xf32> to vector<1x128xf32>
    %107 = arith.mulf %104, %104 : vector<32x128xf32>
    %cst_40 = arith.constant dense<0.000000e+00> : vector<128xf32>
    %108 = vector.multi_reduction <add>, %107, %cst_40 [0] : vector<32x128xf32> to vector<128xf32>
    %109 = vector.shape_cast %108 : vector<128xf32> to vector<1x128xf32>
    %cst_41 = arith.constant 3.125000e-02 : f32
    %110 = vector.broadcast %cst_41 : f32 to vector<1x128xf32>
    %111 = arith.mulf %106, %110 : vector<1x128xf32>
    %cst_42 = arith.constant 3.125000e-02 : f32
    %112 = vector.broadcast %cst_42 : f32 to vector<1x128xf32>
    %113 = arith.mulf %109, %112 : vector<1x128xf32>
    %114 = arith.mulf %111, %111 : vector<1x128xf32>
    %115 = arith.subf %113, %114 : vector<1x128xf32>
    %cst_43 = arith.constant 0.000000e+00 : f32
    %116 = vector.broadcast %cst_43 : f32 to vector<1x128xf32>
    %117 = arith.maximumf %115, %116 : vector<1x128xf32>
    %118 = vector.broadcast %111 : vector<1x128xf32> to vector<32x128xf32>
    %119 = arith.subf %104, %118 : vector<32x128xf32>
    %cst_44 = arith.constant 9.99999974E-6 : f32
    %120 = vector.broadcast %cst_44 : f32 to vector<1x128xf32>
    %121 = arith.addf %117, %120 : vector<1x128xf32>
    %122 = math.rsqrt %121 : vector<1x128xf32>
    %123 = vector.broadcast %122 : vector<1x128xf32> to vector<32x128xf32>
    %124 = arith.mulf %119, %123 : vector<32x128xf32>
    %125 = arith.index_cast %c2_i32 : i32 to index
    %c0_45 = arith.constant 0 : index
    %c0_46 = arith.constant 0 : index
    %126 = vector.load %arg6[%125, %c0_45, %c0_46] : memref<4x32x1xf32, #tpu.memory_space<vmem>>, vector<1x32x1xf32>
    %127 = vector.shape_cast %126 : vector<1x32x1xf32> to vector<32x1xf32>
    %128 = vector.broadcast %127 : vector<32x1xf32> to vector<32x128xf32>
    %129 = arith.mulf %124, %128 : vector<32x128xf32>
    %130 = arith.index_cast %c2_i32 : i32 to index
    %c0_47 = arith.constant 0 : index
    %c0_48 = arith.constant 0 : index
    %131 = vector.load %arg7[%130, %c0_47, %c0_48] : memref<4x32x1xf32, #tpu.memory_space<vmem>>, vector<1x32x1xf32>
    %132 = vector.shape_cast %131 : vector<1x32x1xf32> to vector<32x1xf32>
    %133 = vector.broadcast %132 : vector<32x1xf32> to vector<32x128xf32>
    %134 = arith.addf %129, %133 : vector<32x128xf32>
    %135 = math.tanh %134 : vector<32x128xf32>
    %c3_i32 = arith.constant 3 : i32
    %136 = arith.index_cast %c3_i32 : i32 to index
    %c0_49 = arith.constant 0 : index
    %c0_50 = arith.constant 0 : index
    %137 = vector.load %arg4[%136, %c0_49, %c0_50] : memref<4x32x32xf32, #tpu.memory_space<vmem>>, vector<1x32x32xf32>
    %138 = vector.shape_cast %137 : vector<1x32x32xf32> to vector<32x32xf32>
    %cst_51 = arith.constant dense<0.000000e+00> : vector<32x128xf32>
    %139 = tpu.matmul %138, %135, %cst_51 {dimension_numbers = #tpu.dot_dimension_numbers<[1], [0], [0], [1], [0, 0, 1, 1], [], []>} : vector<32x32xf32>, vector<32x128xf32>, vector<32x128xf32> -> vector<32x128xf32>
    %140 = arith.index_cast %c3_i32 : i32 to index
    %c0_52 = arith.constant 0 : index
    %c0_53 = arith.constant 0 : index
    %141 = vector.load %arg5[%140, %c0_52, %c0_53] : memref<4x32x1xf32, #tpu.memory_space<vmem>>, vector<1x32x1xf32>
    %142 = vector.shape_cast %141 : vector<1x32x1xf32> to vector<32x1xf32>
    %143 = vector.broadcast %142 : vector<32x1xf32> to vector<32x128xf32>
    %144 = arith.addf %139, %143 : vector<32x128xf32>
    %cst_54 = arith.constant dense<0.000000e+00> : vector<128xf32>
    %145 = vector.multi_reduction <add>, %144, %cst_54 [0] : vector<32x128xf32> to vector<128xf32>
    %146 = vector.shape_cast %145 : vector<128xf32> to vector<1x128xf32>
    %147 = arith.mulf %144, %144 : vector<32x128xf32>
    %cst_55 = arith.constant dense<0.000000e+00> : vector<128xf32>
    %148 = vector.multi_reduction <add>, %147, %cst_55 [0] : vector<32x128xf32> to vector<128xf32>
    %149 = vector.shape_cast %148 : vector<128xf32> to vector<1x128xf32>
    %cst_56 = arith.constant 3.125000e-02 : f32
    %150 = vector.broadcast %cst_56 : f32 to vector<1x128xf32>
    %151 = arith.mulf %146, %150 : vector<1x128xf32>
    %cst_57 = arith.constant 3.125000e-02 : f32
    %152 = vector.broadcast %cst_57 : f32 to vector<1x128xf32>
    %153 = arith.mulf %149, %152 : vector<1x128xf32>
    %154 = arith.mulf %151, %151 : vector<1x128xf32>
    %155 = arith.subf %153, %154 : vector<1x128xf32>
    %cst_58 = arith.constant 0.000000e+00 : f32
    %156 = vector.broadcast %cst_58 : f32 to vector<1x128xf32>
    %157 = arith.maximumf %155, %156 : vector<1x128xf32>
    %158 = vector.broadcast %151 : vector<1x128xf32> to vector<32x128xf32>
    %159 = arith.subf %144, %158 : vector<32x128xf32>
    %cst_59 = arith.constant 9.99999974E-6 : f32
    %160 = vector.broadcast %cst_59 : f32 to vector<1x128xf32>
    %161 = arith.addf %157, %160 : vector<1x128xf32>
    %162 = math.rsqrt %161 : vector<1x128xf32>
    %163 = vector.broadcast %162 : vector<1x128xf32> to vector<32x128xf32>
    %164 = arith.mulf %159, %163 : vector<32x128xf32>
    %165 = arith.index_cast %c3_i32 : i32 to index
    %c0_60 = arith.constant 0 : index
    %c0_61 = arith.constant 0 : index
    %166 = vector.load %arg6[%165, %c0_60, %c0_61] : memref<4x32x1xf32, #tpu.memory_space<vmem>>, vector<1x32x1xf32>
    %167 = vector.shape_cast %166 : vector<1x32x1xf32> to vector<32x1xf32>
    %168 = vector.broadcast %167 : vector<32x1xf32> to vector<32x128xf32>
    %169 = arith.mulf %164, %168 : vector<32x128xf32>
    %170 = arith.index_cast %c3_i32 : i32 to index
    %c0_62 = arith.constant 0 : index
    %c0_63 = arith.constant 0 : index
    %171 = vector.load %arg7[%170, %c0_62, %c0_63] : memref<4x32x1xf32, #tpu.memory_space<vmem>>, vector<1x32x1xf32>
    %172 = vector.shape_cast %171 : vector<1x32x1xf32> to vector<32x1xf32>
    %173 = vector.broadcast %172 : vector<32x1xf32> to vector<32x128xf32>
    %174 = arith.addf %169, %173 : vector<32x128xf32>
    %175 = math.tanh %174 : vector<32x128xf32>
    %c4_i32 = arith.constant 4 : i32
    %c0_64 = arith.constant 0 : index
    %c0_65 = arith.constant 0 : index
    %176 = vector.load %arg8[%c0_64, %c0_65] : memref<2x32xf32, #tpu.memory_space<vmem>>, vector<2x32xf32>
    %cst_66 = arith.constant dense<0.000000e+00> : vector<2x128xf32>
    %177 = tpu.matmul %176, %175, %cst_66 {dimension_numbers = #tpu.dot_dimension_numbers<[1], [0], [0], [1], [0, 0, 1, 1], [], []>} : vector<2x32xf32>, vector<32x128xf32>, vector<2x128xf32> -> vector<2x128xf32>
    %c0_67 = arith.constant 0 : index
    %c0_68 = arith.constant 0 : index
    %178 = vector.load %arg9[%c0_67, %c0_68] : memref<2x1xf32, #tpu.memory_space<vmem>>, vector<2x1xf32>
    %179 = vector.broadcast %178 : vector<2x1xf32> to vector<2x128xf32>
    %180 = arith.addf %177, %179 : vector<2x128xf32>
    %c0_69 = arith.constant 0 : index
    %c0_70 = arith.constant 0 : index
    %181 = vector.load %arg10[%c0_69, %c0_70] : memref<2x128xf32, #tpu.memory_space<vmem>>, vector<2x128xf32>
    tpu.vector_store %arg10[%c0_69, %c0_70], %180 {strides = array<i32>} : memref<2x128xf32, #tpu.memory_space<vmem>>, vector<2x128xf32>,
    return
  }
  func.func @transform_0(%arg0: i32) -> (i32, i32) {
    %c0_i32 = arith.constant 0 : i32
    %c0_i32_0 = arith.constant 0 : i32
    return %c0_i32, %arg0 : i32, i32
  }
  func.func @transform_1(%arg0: i32) -> (i32, i32) {
    %c0_i32 = arith.constant 0 : i32
    %c0_i32_0 = arith.constant 0 : i32
    %c0_i32_1 = arith.constant 0 : i32
    return %c0_i32, %c0_i32_0 : i32, i32
  }
  func.func @transform_2(%arg0: i32) -> (i32, i32) {
    %c0_i32 = arith.constant 0 : i32
    %c0_i32_0 = arith.constant 0 : i32
    %c0_i32_1 = arith.constant 0 : i32
    return %c0_i32, %c0_i32_0 : i32, i32
  }
  func.func @transform_3(%arg0: i32) -> (i32, i32, i32) {
    %c0_i32 = arith.constant 0 : i32
    %c0_i32_0 = arith.constant 0 : i32
    %c0_i32_1 = arith.constant 0 : i32
    %c0_i32_2 = arith.constant 0 : i32
    return %c0_i32, %c0_i32_0, %c0_i32_1 : i32, i32, i32
  }
  func.func @transform_4(%arg0: i32) -> (i32, i32, i32) {
    %c0_i32 = arith.constant 0 : i32
    %c0_i32_0 = arith.constant 0 : i32
    %c0_i32_1 = arith.constant 0 : i32
    %c0_i32_2 = arith.constant 0 : i32
    return %c0_i32, %c0_i32_0, %c0_i32_1 : i32, i32, i32
  }
  func.func @transform_5(%arg0: i32) -> (i32, i32, i32) {
    %c0_i32 = arith.constant 0 : i32
    %c0_i32_0 = arith.constant 0 : i32
    %c0_i32_1 = arith.constant 0 : i32
    %c0_i32_2 = arith.constant 0 : i32
    return %c0_i32, %c0_i32_0, %c0_i32_1 : i32, i32, i32
  }
  func.func @transform_6(%arg0: i32) -> (i32, i32, i32) {
    %c0_i32 = arith.constant 0 : i32
    %c0_i32_0 = arith.constant 0 : i32
    %c0_i32_1 = arith.constant 0 : i32
    %c0_i32_2 = arith.constant 0 : i32
    return %c0_i32, %c0_i32_0, %c0_i32_1 : i32, i32, i32
  }
  func.func @transform_7(%arg0: i32) -> (i32, i32) {
    %c0_i32 = arith.constant 0 : i32
    %c0_i32_0 = arith.constant 0 : i32
    %c0_i32_1 = arith.constant 0 : i32
    return %c0_i32, %c0_i32_0 : i32, i32
  }
  func.func @transform_8(%arg0: i32) -> (i32, i32) {
    %c0_i32 = arith.constant 0 : i32
    %c0_i32_0 = arith.constant 0 : i32
    %c0_i32_1 = arith.constant 0 : i32
    return %c0_i32, %c0_i32_0 : i32, i32
  }
  func.func @transform_9(%arg0: i32) -> (i32, i32) {
    %c0_i32 = arith.constant 0 : i32
    %c0_i32_0 = arith.constant 0 : i32
    return %c0_i32, %arg0 : i32, i32
  }
}

</mosaic_0001>

<bundles_post_ra>
// kernel: tpu_custom_call.1
= control target key start
LH: loop header
LB: loop body
LE: loop exit
PB: predicated region body
PF: predicated region fallthrough
CT: control target
= control target key end

     0   :  { %v1019_v3 = vmov 0   ;;  %s1317_s0 = inlined_call_operand.vmem [shape: f32[2,128], index: 0, kind: input, shape index: {}]   ;;  %s1318_s1 = inlined_call_operand.vmem [shape: f32[32,2], index: 1, kind: input, shape index: {}]   ;;  %s1319_s2 = inlined_call_operand.vmem [shape: f32[32,1], index: 2, kind: input, shape index: {}]   ;;  %s1320_s3 = inlined_call_operand.vmem [shape: f32[4,32,32], index: 3, kind: input, shape index: {}]   ;;  %s1321_s4 = inlined_call_operand.vmem [shape: f32[4,32,1], index: 4, kind: input, shape index: {}]   ;;  %s1322_s5 = inlined_call_operand.vmem [shape: f32[4,32,1], index: 5, kind: input, shape index: {}]   ;;  %s1323_s6 = inlined_call_operand.vmem [shape: f32[4,32,1], index: 6, kind: input, shape index: {}]   ;;  %s1324_s7 = inlined_call_operand.vmem [shape: f32[2,32], index: 7, kind: input, shape index: {}]   ;;  %s1325_s8 = inlined_call_operand.vmem [shape: f32[2,1], index: 8, kind: input, shape index: {}]   ;;  %s1326_s9 = inlined_call_operand.hbm [shape: f32[2,128], index: 9, kind: output, shape index: {}]  }
   0x1   :  { %v37_v0 = vld [vmem:[%s1318_s1 + $0x18] sm:$0xff]  ;;  %v36_v1 = vld [vmem:[%s1318_s1 + $0x10] sm:$0xff]  ;;  %v35_v2 = vld [vmem:[%s1318_s1 + $0x8] sm:$0xff]  ;;  %948 = vset.pattern.permute.xlu2 %v1019_v3  ;;  %946 = vset.pattern.permute.xlu1 %v1019_v3 }
   0x2   :  { %944 = vset.pattern.permute.xlu0 %v1019_v3  ;;  %50 = vperm.xlu1 %946, %v36_v1  }
   0x3   :  { %55 = vperm.xlu0 %944, %v37_v0   ;;  %45 = vperm.xlu2 %948, %v35_v2  }
   0x4   :  { %14 = vsyncpa [#allocation3], 0  ;;  %v1020_v4 = vmov 1   ;;  %v34_v5 = vld [vmem:[%s1318_s1] sm:$0xff]  ;;  %v91_v6 = vld [vmem:[%s1319_s2 + $0x18] sm:$0xff]  ;;  %vm144_vm0 = vcmask 261120  }
   0x5   :  { %v90_v7 = vld [vmem:[%s1319_s2 + $0x10] sm:$0xff]  ;;  %v88_v8 = vld [vmem:[%s1319_s2] sm:$0xff]  ;;  %v89_v9 = vld [vmem:[%s1319_s2 + $0x8] sm:$0xff] }
   0x6   :  { %v120_v10 = vld [vmem:[%s1321_s4] sm:$0xff]  ;;  %v235_v11 = vld [vmem:[%s1322_s5 + $0x18] sm:$0xff]  ;;  %v121_v12 = vld [vmem:[%s1321_s4 + $0x8] sm:$0xff] }
   0x7   :  { %v122_v13 = vld [vmem:[%s1321_s4 + $0x10] sm:$0xff]  ;;  %v233_v14 = vld [vmem:[%s1322_s5 + $0x8] sm:$0xff]  ;;  %v123_v15 = vld [vmem:[%s1321_s4 + $0x18] sm:$0xff] }
   0x8   :  { %v234_v16 = vld [vmem:[%s1322_s5 + $0x10] sm:$0xff]  ;;  %v261_v17 = vld [vmem:[%s1323_s6 + $0x8] sm:$0xff]  ;;  %v263_v18 = vld [vmem:[%s1323_s6 + $0x18] sm:$0xff] }
   0x9   :  { %v262_v19 = vld [vmem:[%s1323_s6 + $0x10] sm:$0xff]  ;;  %v885_v20 = vld [vmem:[%s1321_s4 + $0x28] sm:$0xff]  ;;  %v232_v21 = vld [vmem:[%s1322_s5] sm:$0xff] }
   0xa   :  { %947 = vset.pattern.permute.xlu1 %v1020_v4  ;;  %v260_v22 = vld [vmem:[%s1323_s6] sm:$0xff]  ;;  %v895_v23 = vld [vmem:[%s1322_s5 + $0x38] sm:$0xff]  ;;  %v886_v25 = vld [vmem:[%s1321_s4 + $0x30] sm:$0xff] }
   0xb   :  { %945 = vset.pattern.permute.xlu0 %v1020_v4  ;;  %949 = vset.pattern.permute.xlu2 %v1020_v4  ;;  %v884_v24 = vld [vmem:[%s1321_s4 + $0x20] sm:$0xff]  ;;  %v893_v26 = vld [vmem:[%s1322_s5 + $0x28] sm:$0xff]  ;;  %v887_v27 = vld [vmem:[%s1321_s4 + $0x38] sm:$0xff] }
   0xc   :  { %76 = vperm.xlu0 %945, %v37_v0   ;;  %72 = vperm.xlu1 %947, %v36_v1   ;;  %v894_v28 = vld [vmem:[%s1322_s5 + $0x30] sm:$0xff]  ;;  %v897_v29 = vld [vmem:[%s1323_s6 + $0x28] sm:$0xff]  ;;  %v899_v30 = vld [vmem:[%s1323_s6 + $0x38] sm:$0xff] }
   0xd   :  { %68 = vperm.xlu2 %949, %v35_v2   ;;  %v898_v31 = vld [vmem:[%s1323_s6 + $0x30] sm:$0xff]  ;;  %v905_v32 = vld [vmem:[%s1321_s4 + $0x48] sm:$0xff]  ;;  %v892_v33 = vld [vmem:[%s1322_s5 + $0x20] sm:$0xff] }
   0xe   :  { %v896_v34 = vld [vmem:[%s1323_s6 + $0x20] sm:$0xff]  ;;  %v915_v35 = vld [vmem:[%s1322_s5 + $0x58] sm:$0xff]  ;;  %v906_v37 = vld [vmem:[%s1321_s4 + $0x50] sm:$0xff] }
   0xf   :  { %v904_v36 = vld [vmem:[%s1321_s4 + $0x40] sm:$0xff]  ;;  %v913_v38 = vld [vmem:[%s1322_s5 + $0x48] sm:$0xff]  ;;  %v907_v39 = vld [vmem:[%s1321_s4 + $0x58] sm:$0xff] }
  0x10   :  { %v914_v41 = vld [vmem:[%s1322_s5 + $0x50] sm:$0xff]  ;;  %v917_v42 = vld [vmem:[%s1323_s6 + $0x48] sm:$0xff]  ;;  %v919_v43 = vld [vmem:[%s1323_s6 + $0x58] sm:$0xff] }
  0x11   :  { %v918_v46 = vld [vmem:[%s1323_s6 + $0x50] sm:$0xff]  ;;  %v925_v47 = vld [vmem:[%s1321_s4 + $0x68] sm:$0xff]  ;;  %v912_v48 = vld [vmem:[%s1322_s5 + $0x40] sm:$0xff] }
  0x12   :  { %v33_v52 = vld [vmem:[%s1317_s0] sm:$0x3]  ;;  %v935_v57 = vld [vmem:[%s1322_s5 + $0x78] sm:$0xff]  ;;  %v926_v4 = vld [vmem:[%s1321_s4 + $0x70] sm:$0xff]  ;;  %s1021_s0 = smov [#allocation2]  }
  0x13   :  { %v79_v53 = vperm.slane %v33_v52, 1  ;;  %v58_v54 = vperm.slane %v33_v52, 0  ;;  %v916_v56 = vld [vmem:[%s1323_s6 + $0x40] sm:$0xff] }
  0x14   :  { %950 = vset.pattern.permute.xlu1 %v1019_v3  ;;  %64 = vperm.xlu0 %945, %v34_v5   ;;  %v924_v58 = vld [vmem:[%s1321_s4 + $0x60] sm:$0xff] }
  0x15   :  { %951 = vset.pattern.permute.xlu2 %v1019_v3  ;;  %109 = vperm.xlu1 %950, %v91_v6   ;;  %v927_v6 = vld [vmem:[%s1321_s4 + $0x78] sm:$0xff] }
  0x16   :  { %40 = vperm.xlu2 %951, %v34_v5   ;;  %v933_v5 = vld [vmem:[%s1322_s5 + $0x68] sm:$0xff] }
  0x1c   :  { %952 = vset.pattern.permute.xlu0 %v1019_v3 }
  0x1d   :  { %104 = vperm.xlu1 %950, %v90_v7   ;;  %94 = vperm.xlu0 %952, %v88_v8  }
  0x1e   :  { %99 = vperm.xlu2 %951, %v89_v9  }
  0x25   :  { %126 = vperm.xlu1 %950, %v120_v10   ;;  %253 = vperm.xlu0 %952, %v235_v11  }
  0x26   :  { %131 = vperm.xlu2 %951, %v121_v12  }
  0x2d   :  { %136 = vperm.xlu1 %950, %v122_v13   ;;  %243 = vperm.xlu0 %952, %v233_v14  }
  0x2e   :  { %141 = vperm.xlu2 %951, %v123_v15  }
  0x35   :  { %248 = vperm.xlu1 %950, %v234_v16   ;;  %271 = vperm.xlu0 %952, %v261_v17  }
  0x36   :  { %281 = vperm.xlu2 %951, %v263_v18   ;;  %v934_v18 = vld [vmem:[%s1322_s5 + $0x70] sm:$0xff] }
  0x3d   :  { %276 = vperm.xlu1 %950, %v262_v19   ;;  %309 = vperm.xlu0 %952, %v885_v20   ;;  %v937_v19 = vld [vmem:[%s1323_s6 + $0x68] sm:$0xff]  ;;  %v939_v20 = vld [vmem:[%s1323_s6 + $0x78] sm:$0xff] }
  0x3e   :  { %238 = vperm.xlu2 %951, %v232_v21  }
  0x45   :  { %266 = vperm.xlu1 %950, %v260_v22   ;;  %431 = vperm.xlu0 %952, %v895_v23   ;;  %v116_v22 = vld [vmem:[%s1320_s3] sm:$0xff]  ;;  %v938_v23 = vld [vmem:[%s1323_s6 + $0x70] sm:$0xff] }
  0x46   :  { %304 = vperm.xlu2 %951, %v884_v24   ;;  %v932_v24 = vld [vmem:[%s1322_s5 + $0x60] sm:$0xff]  ;;  %s865_s5 = sshll.u32 %s1021_s0, 4  ;;  %s866_s5 = int_to_ptr.vmem [resolvable:$true] %s865_s5 }
  0x4d   :  { %314 = vperm.xlu1 %950, %v886_v25   ;;  %421 = vperm.xlu0 %952, %v893_v26   ;;  %v117_v25 = vld [vmem:[%s1320_s3 + $0x8] sm:$0xff]  ;;  %v936_v26 = vld [vmem:[%s1323_s6 + $0x60] sm:$0xff] }
  0x4e   :  { %319 = vperm.xlu2 %951, %v887_v27   ;;  %v830_v27 = vld [vmem:[%s1325_s8] sm:$0x3]  ;;  %s867_s8 = sshll.u32 %s1326_s9, 4  ;;  %s868_s8 = int_to_ptr.hbm [resolvable:$true] %s867_s8 }
  0x55   :  { %426 = vperm.xlu1 %950, %v894_v28   ;;  %450 = vperm.xlu0 %952, %v897_v29   ;;  %v118_v28 = vld [vmem:[%s1320_s3 + $0x10] sm:$0xff]  ;;  %v119_v29 = vld [vmem:[%s1320_s3 + $0x18] sm:$0xff] }
  0x56   :  { %460 = vperm.xlu2 %951, %v899_v30  }
  0x5d   :  { %455 = vperm.xlu1 %950, %v898_v31   ;;  %488 = vperm.xlu0 %952, %v905_v32   ;;  %v46_v40 = vpop.permute.xlu2 %45 }
  0x5e   :  { %416 = vperm.xlu2 %951, %v892_v33   ;;  %v60_v1 = vmul.f32 %v58_v54, %v46_v40 }
  0x65   :  { %445 = vperm.xlu1 %950, %v896_v34   ;;  %610 = vperm.xlu0 %952, %v915_v35  }
  0x66   :  { %483 = vperm.xlu2 %951, %v904_v36  }
  0x67   :  { %v69_v49 = vpop.permute.xlu2 %68 }
  0x68   :  { %v81_v2 = vmul.f32 %v79_v53, %v69_v49 }
  0x6a   :  { %v85_v9 = vadd.f32 %v81_v2, %v60_v1 }
  0x6d   :  { %493 = vperm.xlu1 %950, %v906_v37   ;;  %600 = vperm.xlu0 %952, %v913_v38  }
  0x6e   :  { %498 = vperm.xlu2 %951, %v907_v39  }
  0x70   :  { %v41_v60 = vpop.permute.xlu2 %40 }
  0x71   :  { %v59_v8 = vmul.f32 %v58_v54, %v41_v60 }
  0x74   :  { %v51_v44 = vpop.permute.xlu1 %50 }
  0x75   :  { %605 = vperm.xlu1 %950, %v914_v41   ;;  %629 = vperm.xlu0 %952, %v917_v42   ;;  %v56_v45 = vpop.permute.xlu0 %55  ;;  %v61_v7 = vmul.f32 %v58_v54, %v51_v44 }
  0x76   :  { %639 = vperm.xlu2 %951, %v919_v43   ;;  %v62_v59 = vmul.f32 %v58_v54, %v56_v45 }
  0x78   :  { %v100_v14 = vpop.permute.xlu2 %99 }
  0x79   :  { %v113_v16 = vadd.f32 %v100_v14, %v85_v9 }
  0x7d   :  { %634 = vperm.xlu1 %950, %v918_v46   ;;  %667 = vperm.xlu0 %952, %v925_v47  }
  0x7e   :  { %595 = vperm.xlu2 %951, %v912_v48   ;;  %v77_v50 = vpop.permute.xlu0 %76  ;;  %v73_v51 = vpop.permute.xlu1 %72 }
  0x7f   :  { %v83_v55 = vmul.f32 %v79_v53, %v77_v50  ;;  %v82_v3 = vmul.f32 %v79_v53, %v73_v51 }
  0x80   :  { %v132_v33 = vpop.permute.xlu2 %131 }
  0x81   :  { %v87_v61 = vadd.f32 %v83_v55, %v62_v59  ;;  %v86_v11 = vadd.f32 %v82_v3, %v61_v7 }
  0x85   :  { %624 = vperm.xlu1 %950, %v916_v56   ;;  %789 = vperm.xlu0 %952, %v935_v57  }
  0x86   :  { %662 = vperm.xlu2 %951, %v924_v58   ;;  %v65_v62 = vpop.permute.xlu0 %64 }
  0x87   :  { %v110_v63 = vpop.permute.xlu1 %109  ;;  %v80_v10 = vmul.f32 %v79_v53, %v65_v62 }
  0x88   :  { %v115_v0 = vadd.f32 %v110_v63, %v87_v61  ;;  %v142_v43 = vpop.permute.xlu2 %141 }
  0x89   :  { %v84_v17 = vadd.f32 %v80_v10, %v59_v8 }
  0x8a   :  { %169 = vmatpush.msra.mxu0 %v115_v0 }
  0x8d   :  { %672 = vperm.xlu1 %950, %v926_v4   ;;  %779 = vperm.xlu0 %952, %v933_v5  }
  0x8e   :  { %677 = vperm.xlu2 %951, %v927_v6  }
  0x8f   :  { %v105_v12 = vpop.permute.xlu1 %104  ;;  %v95_v15 = vpop.permute.xlu0 %94 }
  0x90   :  { %v114_v13 = vadd.f32 %v105_v12, %v86_v11  ;;  %v112_v21 = vadd.f32 %v95_v15, %v84_v17  ;;  %v282_v11 = vpop.permute.xlu2 %281 }
  0x92   :  { %170 = vmatpush.msra.mxu0 %v114_v13 }
  0x94   :  { %171 = vmatpush.msra.mxu0 %v113_v16 }
  0x95   :  { %784 = vperm.xlu1 %950, %v934_v18   ;;  %808 = vperm.xlu0 %952, %v937_v19  }
  0x96   :  { %818 = vperm.xlu2 %951, %v939_v20   ;;  %172 = vmatpush.msra.mxu0 %v112_v21 }
  0x97   :  { %876 = vmatmul.msk.f32.vlgmr.msra.gmra.mxu0 %vm144_vm0, %v116_v22  ;;  %v127_v31 = vpop.permute.xlu1 %126  ;;  %v254_v6 = vpop.permute.xlu0 %253 }
  0x9d   :  { %813 = vperm.xlu1 %950, %v938_v23  }
  0x9e   :  { %774 = vperm.xlu2 %951, %v932_v24  }
  0x9f   :  { %877 = vmatmul.msk.f32.gmra.mxu0 %vm144_vm0, %v117_v25  ;;  %v137_v36 = vpop.permute.xlu1 %136  ;;  %v244_v13 = vpop.permute.xlu0 %243 }
  0xa5   :  { %803 = vperm.xlu1 %950, %v936_v26  }
  0xa6   :  { %833 = vperm.xlu2 %951, %v830_v27  }
  0xa7   :  { %878 = vmatmul.msk.f32.gmra.mxu0 %vm144_vm0, %v118_v28  ;;  %v249_v7 = vpop.permute.xlu1 %248 }
  0xaf   :  { %879 = vmatmul.msk.f32.gmra.mxu0 %vm144_vm0, %v119_v29  ;;  %v277_v15 = vpop.permute.xlu1 %276  ;;  %v239_v29 = vpop.permute.xlu2 %238 }
 0x114   :  { %v174_v30 = vpop.f32.mrf.mxu0 }
 0x115   :  { %v175_v37 = vadd.f32 %v174_v30, %v127_v31 }
 0x117   :  { %v195_v40 = vmul.f32 %v175_v37, %v175_v37 }
 0x11c   :  { %v177_v32 = vpop.f32.mrf.mxu0 }
 0x11d   :  { %v178_v35 = vadd.f32 %v177_v32, %v132_v33  ;;  %v272_v33 = vpop.permute.xlu0 %271 }
 0x11f   :  { %v196_v39 = vmul.f32 %v178_v35, %v178_v35  ;;  %v186_v41 = vadd.f32 %v178_v35, %v175_v37 }
 0x121   :  { %v199_v45 = vadd.f32 %v196_v39, %v195_v40  ;;  %v880_v40 = vld [vmem:[%s1320_s3 + $0x20] sm:$0xff] }
 0x124   :  { %v180_v34 = vpop.f32.mrf.mxu0 }
 0x125   :  { %v181_v38 = vadd.f32 %v180_v34, %v137_v36  ;;  %v267_v36 = vpop.permute.xlu1 %266 }
 0x127   :  { %v197_v42 = vmul.f32 %v181_v38, %v181_v38  ;;  %v187_v46 = vadd.f32 %v186_v41, %v181_v38 }
 0x129   :  { %v200_v48 = vadd.f32 %v199_v45, %v197_v42  ;;  %v881_v42 = vld [vmem:[%s1320_s3 + $0x28] sm:$0xff] }
 0x12c   :  { %v183_v44 = vpop.f32.mrf.mxu0 }
 0x12d   :  { %v184_v47 = vadd.f32 %v183_v44, %v142_v43  ;;  %v882_v43 = vld [vmem:[%s1320_s3 + $0x30] sm:$0xff]  ;;  %v883_v44 = vld [vmem:[%s1320_s3 + $0x38] sm:$0xff] }
 0x12f   :  { %v188_v49 = vadd.f32 %v187_v46, %v184_v47  ;;  %v198_v50 = vmul.f32 %v184_v47, %v184_v47 }
 0x131   :  { %v189_v51 = vrot.slane %v188_v49, 4  ;;  %v201_v52 = vadd.f32 %v200_v48, %v198_v50  ;;  %v310_v48 = vpop.permute.xlu0 %309 }
 0x133   :  { %v190_v53 = vadd.f32 %v189_v51, %v188_v49  ;;  %v202_v54 = vrot.slane %v201_v52, 4  ;;  %v315_v51 = vpop.permute.xlu1 %314 }
 0x135   :  { %v191_v55 = vrot.slane %v190_v53, 2  ;;  %v203_v56 = vadd.f32 %v202_v54, %v201_v52 }
 0x137   :  { %v192_v57 = vadd.f32 %v191_v55, %v190_v53  ;;  %v204_v58 = vrot.slane %v203_v56, 2 }
 0x139   :  { %v193_v59 = vrot.slane %v192_v57, 1  ;;  %v205_v60 = vadd.f32 %v204_v58, %v203_v56 }
 0x13b   :  { %v194_v61 = vadd.f32 %v193_v59, %v192_v57  ;;  %v206_v62 = vrot.slane %v205_v60, 1 }
 0x13d   :  { %v207_v63 = vadd.f32 %v206_v62, %v205_v60  ;;  %v208_v0 = vmul.f32 0.03125, %v194_v61 }
 0x13f   :  { %v209_v1 = vmul.f32 0.03125, %v207_v63  ;;  %v210_v2 = vmul.f32 %v208_v0, %v208_v0  ;;  %v216_v17 = vsub.f32 %v184_v47, %v208_v0  ;;  %v215_v18 = vsub.f32 %v181_v38, %v208_v0  ;;  %v305_v47 = vpop.permute.xlu2 %304 }
 0x140   :  { %v214_v19 = vsub.f32 %v178_v35, %v208_v0  ;;  %v213_v20 = vsub.f32 %v175_v37, %v208_v0 }
 0x141   :  { %v211_v3 = vsub.f32 %v209_v1, %v210_v2 }
 0x143   :  { %v212_v4 = vmax.f32 %v211_v3, 0.0 }
 0x145   :  { %v217_v5 = vadd.f32 1e-05, %v212_v4 }
 0x147   :  { %953 = vrsqrt.f32 %v217_v5  ;;  %vm224_vm2 = vweird.f32 %v217_v5  ;;  %v320_v58 = vpop.permute.xlu2 %319 }
 0x14d   :  { %v954_v8 = vpop.eup %953 }
 0x14e   :  { %v219_v9 = vmul.f32 %v954_v8, %v217_v5  ;;  %vm225_vm1 = vweird.f32 %v954_v8 }
 0x14f   :  { %vm226_vm3 = vmor %vm224_vm2, %vm225_vm1 }
 0x150   :  { %v220_v10 = vmul.f32 %v954_v8, %v219_v9 }
 0x152   :  { %v221_v12 = vmul.f32 0.5, %v220_v10 }
 0x154   :  { %v222_v14 = vsub.f32 1.5, %v221_v12 }
 0x156   :  { %v223_v16 = vmul.f32 %v954_v8, %v222_v14 }
 0x158   :  { %v227_v21 = vsel %vm226_vm3, %v954_v8, %v223_v16 }
 0x159   :  { %v231_v22 = vmul.f32 %v227_v21, %v216_v17  ;;  %v230_v23 = vmul.f32 %v227_v21, %v215_v18  ;;  %v229_v24 = vmul.f32 %v227_v21, %v214_v19  ;;  %v228_v25 = vmul.f32 %v227_v21, %v213_v20  ;;  %v432_v21 = vpop.permute.xlu0 %431 }
 0x15b   :  { %v259_v26 = vmul.f32 %v254_v6, %v231_v22  ;;  %v258_v27 = vmul.f32 %v249_v7, %v230_v23  ;;  %v257_v28 = vmul.f32 %v244_v13, %v229_v24  ;;  %v256_v32 = vmul.f32 %v239_v29, %v228_v25  ;;  %v427_v22 = vpop.permute.xlu1 %426 }
 0x15d   :  { %v287_v30 = vadd.f32 %v282_v11, %v259_v26  ;;  %v286_v31 = vadd.f32 %v277_v15, %v258_v27  ;;  %v285_v34 = vadd.f32 %v272_v33, %v257_v28  ;;  %v284_v38 = vadd.f32 %v267_v36, %v256_v32  ;;  %v461_v26 = vpop.permute.xlu2 %460 }
 0x15f   :  { %955 = vtanh.f32 %v287_v30 }
 0x160   :  { %957 = vtanh.f32 %v286_v31 }
 0x161   :  { %959 = vtanh.f32 %v285_v34  ;;  %v422_v28 = vpop.permute.xlu0 %421 }
 0x162   :  { %961 = vtanh.f32 %v284_v38 }
 0x163   :  { %v456_v30 = vpop.permute.xlu1 %455 }
 0x165   :  { %v956_v35 = vpop.eup %955 }
 0x166   :  { %346 = vmatpush.msra.mxu1 %v956_v35  ;;  %v958_v37 = vpop.eup %957 }
 0x167   :  { %v960_v39 = vpop.eup %959 }
 0x168   :  { %347 = vmatpush.msra.mxu1 %v958_v37  ;;  %v962_v41 = vpop.eup %961 }
 0x16a   :  { %348 = vmatpush.msra.mxu1 %v960_v39 }
 0x16c   :  { %349 = vmatpush.msra.mxu1 %v962_v41 }
 0x16d   :  { %888 = vmatmul.msk.f32.vlgmr.msra.gmra.mxu1 %vm144_vm0, %v880_v40 }
 0x175   :  { %889 = vmatmul.msk.f32.gmra.mxu1 %vm144_vm0, %v881_v42 }
 0x17d   :  { %890 = vmatmul.msk.f32.gmra.mxu1 %vm144_vm0, %v882_v43 }
 0x185   :  { %891 = vmatmul.msk.f32.gmra.mxu1 %vm144_vm0, %v883_v44  ;;  %v417_v44 = vpop.permute.xlu2 %416 }
 0x1ea   :  { %v351_v45 = vpop.f32.mrf.mxu1 }
 0x1eb   :  { %v352_v52 = vadd.f32 %v351_v45, %v305_v47 }
 0x1ed   :  { %v372_v55 = vmul.f32 %v352_v52, %v352_v52 }
 0x1f2   :  { %v354_v46 = vpop.f32.mrf.mxu1 }
 0x1f3   :  { %v355_v50 = vadd.f32 %v354_v46, %v310_v48  ;;  %v451_v48 = vpop.permute.xlu0 %450 }
 0x1f5   :  { %v373_v54 = vmul.f32 %v355_v50, %v355_v50  ;;  %v363_v56 = vadd.f32 %v355_v50, %v352_v52 }
 0x1f7   :  { %v376_v60 = vadd.f32 %v373_v54, %v372_v55  ;;  %v900_v55 = vld [vmem:[%s1320_s3 + $0x40] sm:$0xff] }
 0x1fa   :  { %v357_v49 = vpop.f32.mrf.mxu1 }
 0x1fb   :  { %v358_v53 = vadd.f32 %v357_v49, %v315_v51  ;;  %v446_v51 = vpop.permute.xlu1 %445 }
 0x1fd   :  { %v374_v57 = vmul.f32 %v358_v53, %v358_v53  ;;  %v364_v61 = vadd.f32 %v363_v56, %v358_v53 }
 0x1ff   :  { %v377_v63 = vadd.f32 %v376_v60, %v374_v57  ;;  %v901_v57 = vld [vmem:[%s1320_s3 + $0x48] sm:$0xff] }
 0x202   :  { %v360_v59 = vpop.f32.mrf.mxu1 }
 0x203   :  { %v361_v62 = vadd.f32 %v360_v59, %v320_v58  ;;  %v902_v58 = vld [vmem:[%s1320_s3 + $0x50] sm:$0xff]  ;;  %v903_v59 = vld [vmem:[%s1320_s3 + $0x58] sm:$0xff] }
 0x205   :  { %v365_v0 = vadd.f32 %v364_v61, %v361_v62  ;;  %v375_v1 = vmul.f32 %v361_v62, %v361_v62 }
 0x207   :  { %v366_v2 = vrot.slane %v365_v0, 4  ;;  %v378_v3 = vadd.f32 %v377_v63, %v375_v1  ;;  %v489_v63 = vpop.permute.xlu0 %488 }
 0x209   :  { %v367_v4 = vadd.f32 %v366_v2, %v365_v0  ;;  %v379_v5 = vrot.slane %v378_v3, 4  ;;  %v494_v2 = vpop.permute.xlu1 %493 }
 0x20b   :  { %v368_v6 = vrot.slane %v367_v4, 2  ;;  %v380_v7 = vadd.f32 %v379_v5, %v378_v3 }
 0x20d   :  { %v369_v8 = vadd.f32 %v368_v6, %v367_v4  ;;  %v381_v9 = vrot.slane %v380_v7, 2 }
 0x20f   :  { %v370_v10 = vrot.slane %v369_v8, 1  ;;  %v382_v11 = vadd.f32 %v381_v9, %v380_v7 }
 0x211   :  { %v371_v12 = vadd.f32 %v370_v10, %v369_v8  ;;  %v383_v13 = vrot.slane %v382_v11, 1 }
 0x213   :  { %v384_v14 = vadd.f32 %v383_v13, %v382_v11  ;;  %v385_v15 = vmul.f32 0.03125, %v371_v12 }
 0x215   :  { %v386_v16 = vmul.f32 0.03125, %v384_v14  ;;  %v387_v17 = vmul.f32 %v385_v15, %v385_v15  ;;  %v393_v32 = vsub.f32 %v361_v62, %v385_v15  ;;  %v392_v33 = vsub.f32 %v358_v53, %v385_v15  ;;  %v484_v62 = vpop.permute.xlu2 %483 }
 0x216   :  { %v391_v34 = vsub.f32 %v355_v50, %v385_v15  ;;  %v390_v36 = vsub.f32 %v352_v52, %v385_v15 }
 0x217   :  { %v388_v18 = vsub.f32 %v386_v16, %v387_v17 }
 0x219   :  { %v389_v19 = vmax.f32 %v388_v18, 0.0 }
 0x21b   :  { %v394_v20 = vadd.f32 1e-05, %v389_v19 }
 0x21d   :  { %963 = vrsqrt.f32 %v394_v20  ;;  %vm401_vm5 = vweird.f32 %v394_v20  ;;  %v499_v9 = vpop.permute.xlu2 %498 }
 0x223   :  { %v964_v23 = vpop.eup %963 }
 0x224   :  { %v396_v24 = vmul.f32 %v964_v23, %v394_v20  ;;  %vm402_vm4 = vweird.f32 %v964_v23 }
 0x225   :  { %vm403_vm6 = vmor %vm401_vm5, %vm402_vm4 }
 0x226   :  { %v397_v25 = vmul.f32 %v964_v23, %v396_v24 }
 0x228   :  { %v398_v27 = vmul.f32 0.5, %v397_v25 }
 0x22a   :  { %v399_v29 = vsub.f32 1.5, %v398_v27 }
 0x22c   :  { %v400_v31 = vmul.f32 %v964_v23, %v399_v29 }
 0x22e   :  { %v404_v38 = vsel %vm403_vm6, %v964_v23, %v400_v31 }
 0x22f   :  { %v408_v35 = vmul.f32 %v404_v38, %v393_v32  ;;  %v407_v37 = vmul.f32 %v404_v38, %v392_v33  ;;  %v406_v39 = vmul.f32 %v404_v38, %v391_v34  ;;  %v405_v40 = vmul.f32 %v404_v38, %v390_v36  ;;  %v611_v38 = vpop.permute.xlu0 %610 }
 0x231   :  { %v437_v41 = vmul.f32 %v432_v21, %v408_v35  ;;  %v436_v42 = vmul.f32 %v427_v22, %v407_v37  ;;  %v435_v43 = vmul.f32 %v422_v28, %v406_v39  ;;  %v434_v47 = vmul.f32 %v417_v44, %v405_v40  ;;  %v606_v35 = vpop.permute.xlu1 %605 }
 0x233   :  { %v466_v45 = vadd.f32 %v461_v26, %v437_v41  ;;  %v465_v46 = vadd.f32 %v456_v30, %v436_v42  ;;  %v464_v49 = vadd.f32 %v451_v48, %v435_v43  ;;  %v463_v53 = vadd.f32 %v446_v51, %v434_v47  ;;  %v640_v41 = vpop.permute.xlu2 %639 }
 0x235   :  { %965 = vtanh.f32 %v466_v45 }
 0x236   :  { %967 = vtanh.f32 %v465_v46 }
 0x237   :  { %969 = vtanh.f32 %v464_v49  ;;  %v601_v43 = vpop.permute.xlu0 %600 }
 0x238   :  { %971 = vtanh.f32 %v463_v53 }
 0x239   :  { %v635_v45 = vpop.permute.xlu1 %634 }
 0x23b   :  { %v966_v50 = vpop.eup %965 }
 0x23c   :  { %525 = vmatpush.msra.mxu2 %v966_v50  ;;  %v968_v52 = vpop.eup %967 }
 0x23d   :  { %v970_v54 = vpop.eup %969 }
 0x23e   :  { %526 = vmatpush.msra.mxu2 %v968_v52  ;;  %v972_v56 = vpop.eup %971 }
 0x240   :  { %527 = vmatpush.msra.mxu2 %v970_v54 }
 0x242   :  { %528 = vmatpush.msra.mxu2 %v972_v56 }
 0x243   :  { %908 = vmatmul.msk.f32.vlgmr.msra.gmra.mxu2 %vm144_vm0, %v900_v55 }
 0x24b   :  { %909 = vmatmul.msk.f32.gmra.mxu2 %vm144_vm0, %v901_v57 }
 0x253   :  { %910 = vmatmul.msk.f32.gmra.mxu2 %vm144_vm0, %v902_v58 }
 0x25b   :  { %911 = vmatmul.msk.f32.gmra.mxu2 %vm144_vm0, %v903_v59  ;;  %v596_v59 = vpop.permute.xlu2 %595 }
 0x2c6   :  { %v530_v60 = vpop.f32.mrf.mxu2 }
 0x2c7   :  { %v531_v3 = vadd.f32 %v530_v60, %v484_v62 }
 0x2c9   :  { %v551_v6 = vmul.f32 %v531_v3, %v531_v3 }
 0x2ce   :  { %v533_v61 = vpop.f32.mrf.mxu2 }
 0x2cf   :  { %v534_v1 = vadd.f32 %v533_v61, %v489_v63  ;;  %v630_v63 = vpop.permute.xlu0 %629 }
 0x2d1   :  { %v552_v5 = vmul.f32 %v534_v1, %v534_v1  ;;  %v542_v7 = vadd.f32 %v534_v1, %v531_v3 }
 0x2d3   :  { %v555_v11 = vadd.f32 %v552_v5, %v551_v6  ;;  %v920_v6 = vld [vmem:[%s1320_s3 + $0x60] sm:$0xff] }
 0x2d6   :  { %v536_v0 = vpop.f32.mrf.mxu2 }
 0x2d7   :  { %v537_v4 = vadd.f32 %v536_v0, %v494_v2  ;;  %v625_v2 = vpop.permute.xlu1 %624 }
 0x2d9   :  { %v553_v8 = vmul.f32 %v537_v4, %v537_v4  ;;  %v543_v12 = vadd.f32 %v542_v7, %v537_v4 }
 0x2db   :  { %v556_v14 = vadd.f32 %v555_v11, %v553_v8  ;;  %v921_v8 = vld [vmem:[%s1320_s3 + $0x68] sm:$0xff] }
 0x2de   :  { %v539_v10 = vpop.f32.mrf.mxu2 }
 0x2df   :  { %v540_v13 = vadd.f32 %v539_v10, %v499_v9  ;;  %v922_v9 = vld [vmem:[%s1320_s3 + $0x70] sm:$0xff]  ;;  %v923_v10 = vld [vmem:[%s1320_s3 + $0x78] sm:$0xff] }
 0x2e1   :  { %v544_v15 = vadd.f32 %v543_v12, %v540_v13  ;;  %v554_v16 = vmul.f32 %v540_v13, %v540_v13 }
 0x2e3   :  { %v545_v17 = vrot.slane %v544_v15, 4  ;;  %v557_v18 = vadd.f32 %v556_v14, %v554_v16  ;;  %v668_v14 = vpop.permute.xlu0 %667 }
 0x2e5   :  { %v546_v19 = vadd.f32 %v545_v17, %v544_v15  ;;  %v558_v20 = vrot.slane %v557_v18, 4  ;;  %v673_v17 = vpop.permute.xlu1 %672 }
 0x2e7   :  { %v547_v21 = vrot.slane %v546_v19, 2  ;;  %v559_v22 = vadd.f32 %v558_v20, %v557_v18 }
 0x2e9   :  { %v548_v23 = vadd.f32 %v547_v21, %v546_v19  ;;  %v560_v24 = vrot.slane %v559_v22, 2 }
 0x2eb   :  { %v549_v25 = vrot.slane %v548_v23, 1  ;;  %v561_v26 = vadd.f32 %v560_v24, %v559_v22 }
 0x2ed   :  { %v550_v27 = vadd.f32 %v549_v25, %v548_v23  ;;  %v562_v28 = vrot.slane %v561_v26, 1 }
 0x2ef   :  { %v563_v29 = vadd.f32 %v562_v28, %v561_v26  ;;  %v564_v30 = vmul.f32 0.03125, %v550_v27 }
 0x2f1   :  { %v565_v31 = vmul.f32 0.03125, %v563_v29  ;;  %v566_v32 = vmul.f32 %v564_v30, %v564_v30  ;;  %v572_v47 = vsub.f32 %v540_v13, %v564_v30  ;;  %v571_v48 = vsub.f32 %v537_v4, %v564_v30  ;;  %v663_v13 = vpop.permute.xlu2 %662 }
 0x2f2   :  { %v570_v49 = vsub.f32 %v534_v1, %v564_v30  ;;  %v569_v51 = vsub.f32 %v531_v3, %v564_v30 }
 0x2f3   :  { %v567_v33 = vsub.f32 %v565_v31, %v566_v32 }
 0x2f5   :  { %v568_v34 = vmax.f32 %v567_v33, 0.0 }
 0x2f7   :  { %v573_v36 = vadd.f32 1e-05, %v568_v34 }
 0x2f9   :  { %973 = vrsqrt.f32 %v573_v36  ;;  %vm580_vm8 = vweird.f32 %v573_v36  ;;  %v678_v24 = vpop.permute.xlu2 %677 }
 0x2ff   :  { %v974_v37 = vpop.eup %973 }
 0x300   :  { %v575_v39 = vmul.f32 %v974_v37, %v573_v36  ;;  %vm581_vm7 = vweird.f32 %v974_v37 }
 0x301   :  { %vm582_vm9 = vmor %vm580_vm8, %vm581_vm7 }
 0x302   :  { %v576_v40 = vmul.f32 %v974_v37, %v575_v39 }
 0x304   :  { %v577_v42 = vmul.f32 0.5, %v576_v40 }
 0x306   :  { %v578_v44 = vsub.f32 1.5, %v577_v42 }
 0x308   :  { %v579_v46 = vmul.f32 %v974_v37, %v578_v44 }
 0x30a   :  { %v583_v53 = vsel %vm582_vm9, %v974_v37, %v579_v46 }
 0x30b   :  { %v587_v50 = vmul.f32 %v583_v53, %v572_v47  ;;  %v586_v52 = vmul.f32 %v583_v53, %v571_v48  ;;  %v585_v54 = vmul.f32 %v583_v53, %v570_v49  ;;  %v584_v55 = vmul.f32 %v583_v53, %v569_v51  ;;  %v790_v53 = vpop.permute.xlu0 %789 }
 0x30d   :  { %v616_v56 = vmul.f32 %v611_v38, %v587_v50  ;;  %v615_v57 = vmul.f32 %v606_v35, %v586_v52  ;;  %v614_v58 = vmul.f32 %v601_v43, %v585_v54  ;;  %v613_v62 = vmul.f32 %v596_v59, %v584_v55  ;;  %v785_v50 = vpop.permute.xlu1 %784 }
 0x30f   :  { %v645_v60 = vadd.f32 %v640_v41, %v616_v56  ;;  %v644_v61 = vadd.f32 %v635_v45, %v615_v57  ;;  %v643_v0 = vadd.f32 %v630_v63, %v614_v58  ;;  %v642_v4 = vadd.f32 %v625_v2, %v613_v62  ;;  %v819_v56 = vpop.permute.xlu2 %818 }
 0x311   :  { %975 = vtanh.f32 %v645_v60 }
 0x312   :  { %977 = vtanh.f32 %v644_v61 }
 0x313   :  { %979 = vtanh.f32 %v643_v0  ;;  %v780_v58 = vpop.permute.xlu0 %779 }
 0x314   :  { %981 = vtanh.f32 %v642_v4 }
 0x315   :  { %v814_v60 = vpop.permute.xlu1 %813 }
 0x317   :  { %v976_v1 = vpop.eup %975 }
 0x318   :  { %704 = vmatpush.msra.mxu3 %v976_v1  ;;  %v978_v3 = vpop.eup %977 }
 0x319   :  { %v980_v5 = vpop.eup %979 }
 0x31a   :  { %705 = vmatpush.msra.mxu3 %v978_v3  ;;  %v982_v7 = vpop.eup %981 }
 0x31c   :  { %706 = vmatpush.msra.mxu3 %v980_v5 }
 0x31e   :  { %707 = vmatpush.msra.mxu3 %v982_v7 }
 0x31f   :  { %928 = vmatmul.msk.f32.vlgmr.msra.gmra.mxu3 %vm144_vm0, %v920_v6 }
 0x327   :  { %929 = vmatmul.msk.f32.gmra.mxu3 %vm144_vm0, %v921_v8 }
 0x32f   :  { %930 = vmatmul.msk.f32.gmra.mxu3 %vm144_vm0, %v922_v9 }
 0x337   :  { %931 = vmatmul.msk.f32.gmra.mxu3 %vm144_vm0, %v923_v10  ;;  %v775_v10 = vpop.permute.xlu2 %774 }
 0x3a2   :  { %v709_v11 = vpop.f32.mrf.mxu3 }
 0x3a3   :  { %v710_v18 = vadd.f32 %v709_v11, %v663_v13 }
 0x3a5   :  { %v730_v21 = vmul.f32 %v710_v18, %v710_v18 }
 0x3aa   :  { %v712_v12 = vpop.f32.mrf.mxu3 }
 0x3ab   :  { %v713_v16 = vadd.f32 %v712_v12, %v668_v14  ;;  %v809_v14 = vpop.permute.xlu0 %808 }
 0x3ad   :  { %v731_v20 = vmul.f32 %v713_v16, %v713_v16  ;;  %v721_v22 = vadd.f32 %v713_v16, %v710_v18 }
 0x3af   :  { %v734_v26 = vadd.f32 %v731_v20, %v730_v21  ;;  %v829_v21 = vld [vmem:[%s1324_s7] sm:$0x3] }
 0x3b2   :  { %v715_v15 = vpop.f32.mrf.mxu3 }
 0x3b3   :  { %v716_v19 = vadd.f32 %v715_v15, %v673_v17  ;;  %v804_v17 = vpop.permute.xlu1 %803 }
 0x3b5   :  { %v732_v23 = vmul.f32 %v716_v19, %v716_v19  ;;  %v722_v27 = vadd.f32 %v721_v22, %v716_v19 }
 0x3b7   :  { %v735_v29 = vadd.f32 %v734_v26, %v732_v23  ;;  %v834_v23 = vpop.permute.xlu2 %833 }
 0x3ba   :  { %v718_v25 = vpop.f32.mrf.mxu3 }
 0x3bb   :  { %v719_v28 = vadd.f32 %v718_v25, %v678_v24 }
 0x3bd   :  { %v723_v30 = vadd.f32 %v722_v27, %v719_v28  ;;  %v733_v31 = vmul.f32 %v719_v28, %v719_v28 }
 0x3bf   :  { %v724_v32 = vrot.slane %v723_v30, 4  ;;  %v736_v33 = vadd.f32 %v735_v29, %v733_v31 }
 0x3c1   :  { %v725_v34 = vadd.f32 %v724_v32, %v723_v30  ;;  %v737_v36 = vrot.slane %v736_v33, 4 }
 0x3c3   :  { %v726_v38 = vrot.slane %v725_v34, 2  ;;  %v738_v35 = vadd.f32 %v737_v36, %v736_v33 }
 0x3c5   :  { %v727_v37 = vadd.f32 %v726_v38, %v725_v34  ;;  %v739_v39 = vrot.slane %v738_v35, 2 }
 0x3c7   :  { %v728_v40 = vrot.slane %v727_v37, 1  ;;  %v740_v41 = vadd.f32 %v739_v39, %v738_v35 }
 0x3c9   :  { %v729_v42 = vadd.f32 %v728_v40, %v727_v37  ;;  %v741_v43 = vrot.slane %v740_v41, 1 }
 0x3cb   :  { %v742_v44 = vadd.f32 %v741_v43, %v740_v41  ;;  %v743_v45 = vmul.f32 0.03125, %v729_v42 }
 0x3cd   :  { %v744_v46 = vmul.f32 0.03125, %v742_v44  ;;  %v745_v47 = vmul.f32 %v743_v45, %v743_v45  ;;  %v751_v62 = vsub.f32 %v719_v28, %v743_v45  ;;  %v750_v63 = vsub.f32 %v716_v19, %v743_v45 }
 0x3ce   :  { %v749_v0 = vsub.f32 %v713_v16, %v743_v45  ;;  %v748_v2 = vsub.f32 %v710_v18, %v743_v45 }
 0x3cf   :  { %v746_v48 = vsub.f32 %v744_v46, %v745_v47 }
 0x3d1   :  { %v747_v49 = vmax.f32 %v746_v48, 0.0 }
 0x3d3   :  { %v752_v51 = vadd.f32 1e-05, %v747_v49 }
 0x3d5   :  { %983 = vrsqrt.f32 %v752_v51  ;;  %vm759_vm11 = vweird.f32 %v752_v51 }
 0x3db   :  { %v984_v52 = vpop.eup %983 }
 0x3dc   :  { %v754_v54 = vmul.f32 %v984_v52, %v752_v51  ;;  %vm760_vm10 = vweird.f32 %v984_v52 }
 0x3dd   :  { %vm761_vm12 = vmor %vm759_vm11, %vm760_vm10 }
 0x3de   :  { %v755_v55 = vmul.f32 %v984_v52, %v754_v54 }
 0x3e0   :  { %v756_v57 = vmul.f32 0.5, %v755_v55 }
 0x3e2   :  { %v757_v59 = vsub.f32 1.5, %v756_v57 }
 0x3e4   :  { %v758_v61 = vmul.f32 %v984_v52, %v757_v59 }
 0x3e6   :  { %v762_v4 = vsel %vm761_vm12, %v984_v52, %v758_v61 }
 0x3e7   :  { %v766_v1 = vmul.f32 %v762_v4, %v751_v62  ;;  %v765_v3 = vmul.f32 %v762_v4, %v750_v63  ;;  %v764_v5 = vmul.f32 %v762_v4, %v749_v0  ;;  %v763_v6 = vmul.f32 %v762_v4, %v748_v2 }
 0x3e9   :  { %v795_v7 = vmul.f32 %v790_v53, %v766_v1  ;;  %v794_v8 = vmul.f32 %v785_v50, %v765_v3  ;;  %v793_v9 = vmul.f32 %v780_v58, %v764_v5  ;;  %v792_v13 = vmul.f32 %v775_v10, %v763_v6 }
 0x3eb   :  { %v824_v11 = vadd.f32 %v819_v56, %v795_v7  ;;  %v823_v12 = vadd.f32 %v814_v60, %v794_v8  ;;  %v822_v15 = vadd.f32 %v809_v14, %v793_v9  ;;  %v821_v19 = vadd.f32 %v804_v17, %v792_v13 }
 0x3ed   :  { %985 = vtanh.f32 %v824_v11 }
 0x3ee   :  { %987 = vtanh.f32 %v823_v12 }
 0x3ef   :  { %989 = vtanh.f32 %v822_v15 }
 0x3f0   :  { %991 = vtanh.f32 %v821_v19 }
 0x3f3   :  { %v986_v16 = vpop.eup %985 }
 0x3f4   :  { %851 = vmatpush.msrb.mxu0 %v986_v16  ;;  %v988_v18 = vpop.eup %987 }
 0x3f5   :  { %v990_v20 = vpop.eup %989 }
 0x3f6   :  { %852 = vmatpush.msrb.mxu0 %v988_v18  ;;  %v992_v22 = vpop.eup %991 }
 0x3f8   :  { %853 = vmatpush.msrb.mxu0 %v990_v20 }
 0x3fa   :  { %854 = vmatpush.msrb.mxu0 %v992_v22 }
 0x3fb   :  { %940 = vmatmul.msk.f32.vlgmr.msrb.gmra.mxu0 %vm144_vm0, %v829_v21 }
 0x478   :  { %v856_v24 = vpop.f32.mrf.mxu0 }
 0x479   :  { %v857_v25 = vadd.f32 %v856_v24, %v834_v23 }
 0x47b   :  { %859 = vst [vmem:[#allocation2] sm:$0x3] %v857_v25 }
 0x47c   :  { %870 = dma.vmem_to_hbm [thread:$0]  %s866_s5, 32, %s868_s8, [#allocation3]  }
 0x47d   :  { %1017 = dma.done.wait [#allocation3], 32  }
 0x47e   :  { %1018 = vsyncadd [#allocation3], 4294967264 }
 0x47f   :  { %875 = vsyncpa [#allocation3], 1 }

</bundles_post_ra>
